<compile_context>
chip_gen: v6e
topology: v6e:2x2x1
jax: 0.10.0
libtpu: 0.0.40
codegen_flags: <defaults>
</compile_context>

<pallas_src>
import functools

import jax
import jax.numpy as jnp
from jax.experimental import pallas as pl
from jax.experimental.pallas import tpu as pltpu


def _attn_dropout_kernel(q_ref, k_ref, v_ref, u_ref, o_ref, *, scale, p):
    # q_ref: (Bt, Sq, D), k_ref/v_ref: (Bt, Sk, D), u_ref: (Bt, Sq, Sk), o_ref: (Bt, Sq, D)
    q = q_ref[...]
    if scale != 1.0:
        q = q * jnp.float32(1.0 / scale)        # pre-scale q: O(Sq*D) instead of O(Sq*Sk)
    k = k_ref[...]
    v = v_ref[...]

    # scores = (q / scale) @ k^T, contracted over dim_model.
    qk = jnp.einsum("bqd,bkd->bqk", q, k, preferred_element_type=jnp.float32)

    # un-normalized softmax numerator (normalization is deferred past the PV matmul).
    m = jnp.max(qk, axis=-1, keepdims=True)
    e = jnp.exp(qk - m)                                       # (Bt, Sq, Sk)
    row_sum = jnp.sum(e, axis=-1, keepdims=True)              # (Bt, Sq, 1)

    # dropout: keep with prob (1 - p). Mask the *un-normalized* probabilities; the
    # 1/(1-p) rescale is folded into the final row-wise scaling below.
    if p > 0.0:
        keep = u_ref[...] >= jnp.float32(p)                   # P(keep) = 1 - p
        e = jnp.where(keep, e, 0.0)
    inv_keep = 0.0 if p >= 1.0 else 1.0 / (1.0 - p)           # compile-time constant

    # output = dropout(softmax(qk)) @ value, with both row-wise scalings applied on the
    # small (Sq, D) result instead of the (Sq, Sk) matrix (they commute with the Sk sum).
    out = jnp.einsum("bqk,bkd->bqd", e, v, preferred_element_type=jnp.float32)
    out = out * (pl.reciprocal(row_sum, approx=True) * jnp.float32(inv_keep))
    o_ref[...] = out.astype(o_ref.dtype)


def sdpa_dropout(query, key, value, scale_factor, dropout_p, seed=0, batch_block=None):
    B, Sq, D = query.shape
    _, Sk, _ = key.shape
    scale_factor = float(scale_factor)
    dropout_p = float(dropout_p)

    # Whole batch in one grid step by default (tiny shapes: amortize grid overhead).
    if batch_block is None:
        batch_block = B
    assert B % batch_block == 0, "batch_block must divide the batch size"
    grid = (B // batch_block,)

    # Dropout randomness generated outside the kernel (deterministic, portable).
    # TODO(synk): for very long Sk, tile Sk with an online-softmax loop and draw the
    # dropout bits per tile instead of materializing (B, Sq, Sk) in one block.
    u = jax.random.uniform(jax.random.PRNGKey(seed), (B, Sq, Sk), dtype=jnp.float32)

    kernel = functools.partial(_attn_dropout_kernel, scale=scale_factor, p=dropout_p)

    grid_spec = pltpu.PrefetchScalarGridSpec(
        num_scalar_prefetch=0,
        grid=grid,
        in_specs=[
            pl.BlockSpec((batch_block, Sq, D), lambda b: (b, 0, 0)),
            pl.BlockSpec((batch_block, Sk, D), lambda b: (b, 0, 0)),
            pl.BlockSpec((batch_block, Sk, D), lambda b: (b, 0, 0)),
            pl.BlockSpec((batch_block, Sq, Sk), lambda b: (b, 0, 0)),
        ],
        out_specs=pl.BlockSpec((batch_block, Sq, D), lambda b: (b, 0, 0)),
    )

    return pl.pallas_call(
        kernel,
        out_shape=jax.ShapeDtypeStruct((B, Sq, D), jnp.float32),
        grid_spec=grid_spec,
        compiler_params=pltpu.CompilerParams(
            dimension_semantics=("parallel",),   # batch axis is embarrassingly parallel
        ),
    )(query, key, value, u)


def _reference_no_dropout(query, key, value, scale_factor):
    qk = jnp.einsum("bqd,bkd->bqk", query, key) / scale_factor
    sm = jax.nn.softmax(qk, axis=-1)
    return jnp.einsum("bqk,bkd->bqd", sm, value)


if __name__ == "__main__":
    dim_model = 32
    scale_factor = 1.0
    dropout_p = 1.0   # as in the reference script -> output is exactly zero

    k0, k1, k2 = jax.random.split(jax.random.PRNGKey(0), 3)
    query = jax.random.normal(k0, (2, 10, dim_model), jnp.float32)
    key = jax.random.normal(k1, (2, 15, dim_model), jnp.float32)
    value = jax.random.normal(k2, (2, 15, dim_model), jnp.float32)

    # p = 1: dropout kills everything -> exact zeros, deterministic (matches F.dropout(p=1)).
    out_p1 = jax.block_until_ready(
        sdpa_dropout(query, key, value, scale_factor, dropout_p, seed=0)
    )
    assert out_p1.shape == (2, 10, dim_model)
    assert jnp.allclose(out_p1, 0.0), "dropout_p=1 must zero the output"

    # p = 0: dropout is identity -> must match a pure-JAX attention reference
    # (tolerance loosened for the approx reciprocal in the softmax normalization).
    out_p0 = jax.block_until_ready(
        sdpa_dropout(query, key, value, scale_factor, 0.0, seed=0)
    )
    ref_p0 = _reference_no_dropout(query, key, value, scale_factor)
    assert jnp.allclose(out_p0, ref_p0, atol=5e-3, rtol=5e-3)

    print("KERNEL_OK")
</pallas_src>

<mosaic_0001>
module attributes {stable_mosaic.version = 11 : i64} {
  func.func @_attn_dropout_kernel(%arg0: i32, %arg1: memref<2x10x32xf32, #tpu.memory_space<vmem>>, %arg2: memref<2x15x32xf32, #tpu.memory_space<vmem>>, %arg3: memref<2x15x32xf32, #tpu.memory_space<vmem>>, %arg4: memref<2x10x15xf32, #tpu.memory_space<vmem>>, %arg5: memref<2x10x32xf32, #tpu.memory_space<vmem>>) attributes {dimension_semantics = [#tpu.dimension_semantics<parallel>], iteration_bounds = array<i64: 1>, scalar_prefetch = 0 : i64, scratch_operands = 0 : i64, tpu.core_type = #tpu.core_type<tc>, window_params = [{transform_indices = @transform_0, window_bounds = array<i64: 2, 10, 32>}, {transform_indices = @transform_1, window_bounds = array<i64: 2, 15, 32>}, {transform_indices = @transform_2, window_bounds = array<i64: 2, 15, 32>}, {transform_indices = @transform_3, window_bounds = array<i64: 2, 10, 15>}, {transform_indices = @transform_4, window_bounds = array<i64: 2, 10, 32>}]} {
    %c0 = arith.constant 0 : index
    %c0_0 = arith.constant 0 : index
    %c0_1 = arith.constant 0 : index
    %0 = vector.load %arg1[%c0, %c0_0, %c0_1] : memref<2x10x32xf32, #tpu.memory_space<vmem>>, vector<2x10x32xf32>
    %c0_2 = arith.constant 0 : index
    %c0_3 = arith.constant 0 : index
    %c0_4 = arith.constant 0 : index
    %1 = vector.load %arg2[%c0_2, %c0_3, %c0_4] : memref<2x15x32xf32, #tpu.memory_space<vmem>>, vector<2x15x32xf32>
    %c0_5 = arith.constant 0 : index
    %c0_6 = arith.constant 0 : index
    %c0_7 = arith.constant 0 : index
    %2 = vector.load %arg3[%c0_5, %c0_6, %c0_7] : memref<2x15x32xf32, #tpu.memory_space<vmem>>, vector<2x15x32xf32>
    "tpu.trace_start"() <{level = 10 : i32, message = "bqd,bkd->bqk"}> : () -> ()
    %cst = arith.constant dense<0.000000e+00> : vector<2x10x15xf32>
    %3 = tpu.matmul %0, %1, %cst {dimension_numbers = #tpu.dot_dimension_numbers<[2], [2], [1], [1], [0, 0, 0, 1, 1, 1], [0], [0]>} : vector<2x10x32xf32>, vector<2x15x32xf32>, vector<2x10x15xf32> -> vector<2x10x15xf32>
    "tpu.trace_stop"() : () -> ()
    %cst_8 = arith.constant dense<0xFF800000> : vector<2x10xf32>
    %4 = vector.multi_reduction <maximumf>, %3, %cst_8 [2] : vector<2x10x15xf32> to vector<2x10xf32>
    %5 = vector.shape_cast %4 : vector<2x10xf32> to vector<2x10x1xf32>
    %6 = vector.broadcast %5 : vector<2x10x1xf32> to vector<2x10x15xf32>
    %7 = arith.subf %3, %6 : vector<2x10x15xf32>
    %8 = math.exp %7 : vector<2x10x15xf32>
    %cst_9 = arith.constant dense<0.000000e+00> : vector<2x10xf32>
    %9 = vector.multi_reduction <add>, %8, %cst_9 [2] : vector<2x10x15xf32> to vector<2x10xf32>
    %10 = vector.shape_cast %9 : vector<2x10xf32> to vector<2x10x1xf32>
    %c0_10 = arith.constant 0 : index
    %c0_11 = arith.constant 0 : index
    %c0_12 = arith.constant 0 : index
    %11 = vector.load %arg4[%c0_10, %c0_11, %c0_12] : memref<2x10x15xf32, #tpu.memory_space<vmem>>, vector<2x10x15xf32>
    %cst_13 = arith.constant 1.000000e+00 : f32
    %12 = vector.broadcast %cst_13 : f32 to vector<2x10x15xf32>
    %13 = arith.cmpf oge, %11, %12 : vector<2x10x15xf32>
    %cst_14 = arith.constant 0.000000e+00 : f32
    %14 = vector.broadcast %cst_14 : f32 to vector<2x10x15xf32>
    %15 = arith.select %13, %8, %14 : vector<2x10x15xi1>, vector<2x10x15xf32>
    "tpu.trace_start"() <{level = 10 : i32, message = "bqk,bkd->bqd"}> : () -> ()
    %cst_15 = arith.constant dense<0.000000e+00> : vector<2x10x32xf32>
    %16 = tpu.matmul %15, %2, %cst_15 {dimension_numbers = #tpu.dot_dimension_numbers<[2], [1], [1], [2], [0, 0, 0, 1, 1, 2], [0], [0]>} : vector<2x10x15xf32>, vector<2x15x32xf32>, vector<2x10x32xf32> -> vector<2x10x32xf32>
    "tpu.trace_stop"() : () -> ()
    %17 = tpu.reciprocal %10 {approx = true} : vector<2x10x1xf32> -> vector<2x10x1xf32>
    %cst_16 = arith.constant 0.000000e+00 : f32
    %18 = vector.broadcast %cst_16 : f32 to vector<2x10x1xf32>
    %19 = arith.mulf %17, %18 : vector<2x10x1xf32>
    %20 = vector.broadcast %19 : vector<2x10x1xf32> to vector<2x10x32xf32>
    %21 = arith.mulf %16, %20 : vector<2x10x32xf32>
    %c0_17 = arith.constant 0 : index
    %c0_18 = arith.constant 0 : index
    %c0_19 = arith.constant 0 : index
    %22 = vector.load %arg5[%c0_17, %c0_18, %c0_19] : memref<2x10x32xf32, #tpu.memory_space<vmem>>, vector<2x10x32xf32>
    tpu.vector_store %arg5[%c0_17, %c0_18, %c0_19], %21 {strides = array<i32>} : memref<2x10x32xf32, #tpu.memory_space<vmem>>, vector<2x10x32xf32>,
    return
  }
  func.func @transform_0(%arg0: i32) -> (i32, i32, i32) {
    %c0_i32 = arith.constant 0 : i32
    %c0_i32_0 = arith.constant 0 : i32
    %c0_i32_1 = arith.constant 0 : i32
    return %arg0, %c0_i32, %c0_i32_0 : i32, i32, i32
  }
  func.func @transform_1(%arg0: i32) -> (i32, i32, i32) {
    %c0_i32 = arith.constant 0 : i32
    %c0_i32_0 = arith.constant 0 : i32
    %c0_i32_1 = arith.constant 0 : i32
    return %arg0, %c0_i32, %c0_i32_0 : i32, i32, i32
  }
  func.func @transform_2(%arg0: i32) -> (i32, i32, i32) {
    %c0_i32 = arith.constant 0 : i32
    %c0_i32_0 = arith.constant 0 : i32
    %c0_i32_1 = arith.constant 0 : i32
    return %arg0, %c0_i32, %c0_i32_0 : i32, i32, i32
  }
  func.func @transform_3(%arg0: i32) -> (i32, i32, i32) {
    %c0_i32 = arith.constant 0 : i32
    %c0_i32_0 = arith.constant 0 : i32
    %c0_i32_1 = arith.constant 0 : i32
    return %arg0, %c0_i32, %c0_i32_0 : i32, i32, i32
  }
  func.func @transform_4(%arg0: i32) -> (i32, i32, i32) {
    %c0_i32 = arith.constant 0 : i32
    %c0_i32_0 = arith.constant 0 : i32
    %c0_i32_1 = arith.constant 0 : i32
    return %arg0, %c0_i32, %c0_i32_0 : i32, i32, i32
  }
}

</mosaic_0001>

<bundles_post_ra>
// kernel: tpu_custom_call.1
= control target key start
LH: loop header
LB: loop body
LE: loop exit
PB: predicated region body
PF: predicated region fallthrough
CT: control target
= control target key end

     0   :  { %vm29_vm0 = vcmask 261120   ;;  %vm208_vm1 = vcmask 115712   ;;  %vm204_vm2 = vcmask 121856   ;;  %vm260_vm3 = vcmask 1046528   ;;  %s629_s1 = inlined_call_operand.vmem [shape: f32[2,15,32], index: 1, kind: input, shape index: {}]   ;;  %s630_s0 = inlined_call_operand.vmem [shape: f32[2,10,32], index: 0, kind: input, shape index: {}]   ;;  %s631_s2 = inlined_call_operand.vmem [shape: f32[2,15,32], index: 2, kind: input, shape index: {}]   ;;  %s632_s3 = inlined_call_operand.vmem [shape: f32[2,10,15], index: 3, kind: input, shape index: {}]   ;;  %s633_s4 = inlined_call_operand.vmem [shape: f32[2,10,32], index: 4, kind: output, shape index: {}]  }
   0x1   :  { %v22_v0 = vld [vmem:[%s629_s1 + $0x8] sm:$0x7f]  ;;  %v24_v1 = vld [vmem:[%s629_s1 + $0x18] sm:$0x7f]  ;;  %v21_v2 = vld [vmem:[%s629_s1] sm:$0xff]  ;;  %vm436_vm8 = vcmask 254976  }
   0x2   :  { %474 = vmatprep.subr.msk.mxu0 %vm29_vm0, %v22_v0  ;;  %481 = vmatprep.subr.msk.mxu1 %vm29_vm0, %v24_v1  ;;  %v23_v3 = vld [vmem:[%s629_s1 + $0x10] sm:$0xff]  ;;  %v17_v4 = vld [vmem:[%s630_s0] sm:$0xff]  ;;  %v18_v6 = vld [vmem:[%s630_s0 + $0x8] sm:$0x3] }
   0x3   :  { %475 = vmatpush3.xpose.msk.msra.mxu0 %vm29_vm0, %v22_v0  ;;  %482 = vmatpush3.xpose.msk.msra.mxu1 %vm29_vm0, %v24_v1  ;;  %v19_v5 = vld [vmem:[%s630_s0 + $0x10] sm:$0xff]  ;;  %v20_v7 = vld [vmem:[%s630_s0 + $0x18] sm:$0x3]  ;;  %v26_v16 = vld [vmem:[%s631_s2 + $0x8] sm:$0x7f] }
   0x4   :  { %476 = vmatprep.subr.msk.mxu0 %vm29_vm0, %v21_v2  ;;  %483 = vmatprep.subr.msk.mxu1 %vm29_vm0, %v23_v3  ;;  %v25_v17 = vld [vmem:[%s631_s2] sm:$0xff]  ;;  %v28_v18 = vld [vmem:[%s631_s2 + $0x18] sm:$0x7f]  ;;  %v27_v19 = vld [vmem:[%s631_s2 + $0x10] sm:$0xff] }
   0x5   :  { %478 = vmatprep.mubr.msk.f32.mxu0 %vm29_vm0, %v17_v4  ;;  %485 = vmatprep.mubr.msk.f32.mxu1 %vm29_vm0, %v19_v5  ;;  %v242_v32 = vld [vmem:[%s632_s3] sm:$0xff]  ;;  %v243_v33 = vld [vmem:[%s632_s3 + $0x8] sm:$0x3]  ;;  %v244_v36 = vld [vmem:[%s632_s3 + $0x10] sm:$0xff] }
   0x6   :  { %vm246_vm4 = vcmp.ge.f32.partialorder %v242_v32, 1.0  ;;  %vm247_vm5 = vcmp.ge.f32.partialorder %v243_v33, 1.0  ;;  %v245_v38 = vld [vmem:[%s632_s3 + $0x18] sm:$0x3]  ;;  %vm248_vm6 = vcmp.ge.f32.partialorder %v244_v36, 1.0 }
   0x7   :  { %477 = vmatpush3.xpose.msk.msra.mxu0 %vm29_vm0, %v21_v2  ;;  %484 = vmatpush3.xpose.msk.msra.mxu1 %vm29_vm0, %v23_v3  ;;  %vm249_vm7 = vcmp.ge.f32.partialorder %v245_v38, 1.0 }
   0x8   :  { %488 = vmatprep.subr.msk.mxu0 %vm260_vm3, %v26_v16  ;;  %495 = vmatprep.subr.msk.mxu1 %vm260_vm3, %v28_v18 }
   0xa   :  { %479 = vmatmul.mubr.msk.f32.vlgmr.msra.gmra.mxu0 %vm29_vm0, %v18_v6  ;;  %486 = vmatmul.mubr.msk.f32.vlgmr.msra.gmra.mxu1 %vm29_vm0, %v20_v7 }
   0xb   :  { %489 = vmatpush3.msk.msra.mxu0 %vm260_vm3, %v26_v16  ;;  %496 = vmatpush3.msk.msra.mxu1 %vm260_vm3, %v28_v18 }
   0xc   :  { %490 = vmatprep.subr.mxu0 %v25_v17  ;;  %497 = vmatprep.subr.mxu1 %v27_v19 }
   0xd   :  { %491 = vmatpush3.msra.mxu0 %v25_v17  ;;  %498 = vmatpush3.msra.mxu1 %v27_v19 }
  0xca   :  { %v480_v8 = vpop.f32.mrf.mxu0  ;;  %v487_v9 = vpop.f32.mrf.mxu1 }
  0xcb   :  { %v209_v10 = vsel %vm208_vm1, %v480_v8, -inf  ;;  %v215_v13 = vsel %vm208_vm1, %v487_v9, -inf }
  0xcc   :  { %210 = vmax.xlane.f32.xlu1 %v209_v10  ;;  %v108_v11 = vpop.f32.mrf.mxu0  ;;  %v195_v14 = vpop.f32.mrf.mxu1 }
  0xcd   :  { %v205_v12 = vsel %vm204_vm2, %v108_v11, -inf  ;;  %v212_v15 = vsel %vm204_vm2, %v195_v14, -inf }
  0xce   :  { %206 = vmax.xlane.f32.xlu0 %v205_v12 }
  0xd0   :  { %216 = vmax.xlane.f32.xlu1 %v215_v13 }
  0xd2   :  { %213 = vmax.xlane.f32.xlu0 %v212_v15 }
 0x155   :  { %v211_v20 = vpop.xlane.xlu1 %210 }
 0x156   :  { %v219_v21 = vsub.f32 %v480_v8, %v211_v20 }
 0x157   :  { %v207_v22 = vpop.xlane.xlu0 %206 }
 0x158   :  { %v224_v23 = vmul.f32 1.442695, %v219_v21  ;;  %v218_v24 = vsub.f32 %v108_v11, %v207_v22 }
 0x159   :  { %v217_v25 = vpop.xlane.xlu1 %216 }
 0x15a   :  { %502 = vpow2.f32 %v224_v23  ;;  %v222_v26 = vmul.f32 1.442695, %v218_v24  ;;  %v221_v27 = vsub.f32 %v487_v9, %v217_v25 }
 0x15b   :  { %v214_v28 = vpop.xlane.xlu0 %213 }
 0x15c   :  { %504 = vpow2.f32 %v222_v26  ;;  %v228_v29 = vmul.f32 1.442695, %v221_v27  ;;  %v220_v30 = vsub.f32 %v195_v14, %v214_v28 }
 0x15e   :  { %506 = vpow2.f32 %v228_v29  ;;  %v226_v31 = vmul.f32 1.442695, %v220_v30 }
 0x160   :  { %508 = vpow2.f32 %v226_v31 }
 0x167   :  { %v503_v34 = vpop.eup %502 }
 0x168   :  { %v233_v35 = vsel %vm208_vm1, %v503_v34, 0.0  ;;  %v251_v42 = vsel %vm247_vm5, %v503_v34, 0.0 }
 0x169   :  { %v505_v37 = vpop.eup %504  ;;  %234 = vadd.xlane.f32.xlu1 %v233_v35 }
 0x16a   :  { %v250_v39 = vsel %vm246_vm4, %v505_v37, 0.0  ;;  %v230_v40 = vsel %vm204_vm2, %v505_v37, 0.0 }
 0x16b   :  { %v507_v41 = vpop.eup %506  ;;  %492 = vmatprep.mubr.msk.f32.mxu0 %vm204_vm2, %v250_v39  ;;  %231 = vadd.xlane.f32.xlu0 %v230_v40 }
 0x16c   :  { %493 = vmatmul.mubr.msk.f32.vlgmr.msra.gmra.mxu0 %vm204_vm2, %v251_v42  ;;  %v239_v43 = vsel %vm208_vm1, %v507_v41, 0.0  ;;  %v253_v47 = vsel %vm249_vm7, %v507_v41, 0.0 }
 0x16d   :  { %v509_v44 = vpop.eup %508  ;;  %240 = vadd.xlane.f32.xlu1 %v239_v43 }
 0x16e   :  { %v252_v45 = vsel %vm248_vm6, %v509_v44, 0.0  ;;  %v236_v46 = vsel %vm204_vm2, %v509_v44, 0.0 }
 0x16f   :  { %499 = vmatprep.mubr.msk.f32.mxu1 %vm204_vm2, %v252_v45  ;;  %237 = vadd.xlane.f32.xlu0 %v236_v46 }
 0x170   :  { %500 = vmatmul.mubr.msk.f32.vlgmr.msra.gmra.mxu1 %vm204_vm2, %v253_v47 }
 0x1f2   :  { %v235_v48 = vpop.xlane.xlu1 %234 }
 0x1f3   :  { %510 = vrcp.f32 %v235_v48 }
 0x1f4   :  { %v232_v49 = vpop.xlane.xlu0 %231 }
 0x1f5   :  { %512 = vrcp.f32 %v232_v49 }
 0x1f6   :  { %v241_v50 = vpop.xlane.xlu1 %240 }
 0x1f7   :  { %514 = vrcp.f32 %v241_v50 }
 0x1f8   :  { %v238_v51 = vpop.xlane.xlu0 %237 }
 0x1f9   :  { %516 = vrcp.f32 %v238_v51 }
 0x200   :  { %v511_v52 = vpop.eup %510 }
 0x201   :  { %v428_v54 = vmul.f32 0.0, %v511_v52 }
 0x202   :  { %v513_v53 = vpop.eup %512 }
 0x203   :  { %v427_v58 = vmul.f32 0.0, %v513_v53 }
 0x204   :  { %v515_v55 = vpop.eup %514 }
 0x205   :  { %v430_v62 = vmul.f32 0.0, %v515_v55 }
 0x206   :  { %v517_v59 = vpop.eup %516 }
 0x207   :  { %v429_v1 = vmul.f32 0.0, %v517_v59 }
 0x22c   :  { %v494_v56 = vpop.f32.mrf.mxu0 }
 0x22d   :  { %v432_v57 = vmul.f32 %v494_v56, %v428_v54 }
 0x22e   :  { %v330_v60 = vpop.f32.mrf.mxu0 }
 0x22f   :  { %437 = vst.msk [vmem:[%s633_s4 + $0x8] sm:$0x3] %vm436_vm8, %v432_v57  ;;  %v431_v61 = vmul.f32 %v427_v58, %v330_v60 }
 0x230   :  { %v501_v63 = vpop.f32.mrf.mxu1 }
 0x231   :  { %435 = vst.msk [vmem:[%s633_s4] sm:$0xff] %vm29_vm0, %v431_v61  ;;  %v434_v0 = vmul.f32 %v501_v63, %v430_v62 }
 0x232   :  { %v414_v2 = vpop.f32.mrf.mxu1 }
 0x233   :  { %439 = vst.msk [vmem:[%s633_s4 + $0x18] sm:$0x3] %vm436_vm8, %v434_v0  ;;  %v433_v3 = vmul.f32 %v429_v1, %v414_v2 }
 0x235   :  { %438 = vst.msk [vmem:[%s633_s4 + $0x10] sm:$0xff] %vm29_vm0, %v433_v3 }

</bundles_post_ra>
